<compile_context>
chip_gen: v7x
topology: tpu7x:2x2x1
jax: 0.10.0
libtpu: 0.0.40
codegen_flags: <defaults>
</compile_context>

<pallas_src>
import jax
import jax.numpy as jnp
from jax.experimental import pallas as pl
from jax.experimental.pallas import tpu as pltpu

IN_DIM = 256            # linear input features
HID_DIM = 400           # linear output features
GLU_DIM = HID_DIM // 2  # 200
LAT_DIM = GLU_DIM // 2  # 100 (mu / log_sigma width)
PAD = 128               # lane-aligned group width (100 -> 128)
N_PACKED = 4 * PAD      # 512: [a_mu | a_ls | g_mu | g_ls]
OUT_PACKED = 3 * PAD    # 384: [z | mu | log_sigma]
TB_MAX = 1024           # batch rows per grid step (~1 MiB x-tile, well in VMEM)


def _mu_logsigma_kernel(x_ref, w_ref, b_ref, noise_ref, out_ref):
    # Matmul in bf16 (MXU peak on v6e/v7x), accumulate + bias in f32.
    x = x_ref[...].astype(jnp.bfloat16)
    y = jnp.dot(x, w_ref[...], preferred_element_type=jnp.float32) + b_ref[...]
    # y columns (all 128-aligned): [a_mu | a_ls | g_mu | g_ls]
    a = y[:, : 2 * PAD]                      # (TB, 256)
    g = y[:, 2 * PAD:]                       # (TB, 256)
    h = a * jax.nn.sigmoid(g)                # GLU, f32 elementwise (VPU/EUP)
    mu = h[:, :PAD]                          # (TB, 128)  [cols 100:128 are pad]
    log_sigma = h[:, PAD:]                   # (TB, 128)
    sigma = jnp.exp(0.5 * log_sigma)
    z = noise_ref[...] * sigma + mu          # reparameterization
    # Single lane-dense fused store: [z | mu | log_sigma]  -> (TB, 384)
    out_ref[...] = jnp.concatenate([z, mu, log_sigma], axis=1)


def prepare_params(weight, bias, matmul_dtype=jnp.bfloat16):
    """One-time parameter repack.

    weight: (256, 400) such that y = x @ weight + bias (i.e. PyTorch
            linear.weight.T);  bias: (1, 400) or (400,).

    Returns (w_packed, b_packed):
      w_packed: (256, 512) matmul_dtype, columns = [a_mu|a_ls|g_mu|g_ls],
                each 100-wide group zero-padded to 128 lanes.
      b_packed: (1, 512) float32, same column order/padding.
    """
    bias = jnp.asarray(bias, jnp.float32).reshape(1, HID_DIM)
    weight = jnp.asarray(weight, jnp.float32)

    def pad_group(m):  # pad last dim 100 -> 128 with zeros
        return jnp.pad(m, ((0, 0), (0, PAD - LAT_DIM)))

    groups_w = [weight[:, 0:100], weight[:, 100:200],
                weight[:, 200:300], weight[:, 300:400]]
    groups_b = [bias[:, 0:100], bias[:, 100:200],
                bias[:, 200:300], bias[:, 300:400]]
    w_packed = jnp.concatenate([pad_group(g) for g in groups_w], axis=1)
    b_packed = jnp.concatenate([pad_group(g) for g in groups_b], axis=1)
    return w_packed.astype(matmul_dtype), b_packed.astype(jnp.float32)


def mu_logsigma_getter(sentence_embed, w_packed, b_packed, noise):
    """sentence_embed: (B, 256) f32; w_packed/b_packed from prepare_params();
    noise: (B, 100) standard normal.  Returns (z, mu, log_sigma), each (B, 100)."""
    B = sentence_embed.shape[0]

    # Batch tiling: single tile for small B (block == full dim is always legal),
    # otherwise TB_MAX-row tiles with zero-padding of the ragged tail.
    if B <= TB_MAX:
        TB, B_pad = B, B
    else:
        TB = TB_MAX
        B_pad = pl.cdiv(B, TB) * TB

    x_p = jnp.pad(sentence_embed, ((0, B_pad - B), (0, 0)))
    noise_p = jnp.pad(noise, ((0, B_pad - B), (0, PAD - LAT_DIM)))

    grid = (B_pad // TB,)

    cost = pl.CostEstimate(
        flops=2 * B_pad * IN_DIM * N_PACKED,
        transcendentals=B_pad * (2 * PAD + PAD),          # sigmoid(256)+exp(128)
        bytes_accessed=(B_pad * IN_DIM * 4                # x
                        + B_pad * PAD * 4                 # noise
                        + IN_DIM * N_PACKED * w_packed.dtype.itemsize
                        + N_PACKED * 4                    # bias
                        + B_pad * OUT_PACKED * 4),        # fused output
    )

    fused = pl.pallas_call(
        _mu_logsigma_kernel,
        out_shape=jax.ShapeDtypeStruct((B_pad, OUT_PACKED), jnp.float32),
        grid_spec=pltpu.PrefetchScalarGridSpec(
            num_scalar_prefetch=0,
            grid=grid,
            in_specs=[
                pl.BlockSpec((TB, IN_DIM), lambda i: (i, 0)),      # x tile
                pl.BlockSpec((IN_DIM, N_PACKED), lambda i: (0, 0)),  # resident W
                pl.BlockSpec((1, N_PACKED), lambda i: (0, 0)),       # resident b
                pl.BlockSpec((TB, PAD), lambda i: (i, 0)),         # noise tile
            ],
            out_specs=pl.BlockSpec((TB, OUT_PACKED), lambda i: (i, 0)),
        ),
        compiler_params=pltpu.CompilerParams(
            dimension_semantics=("parallel",)),
        cost_estimate=cost,
    )(x_p, w_packed, b_packed, noise_p)

    z = fused[:B, 0:LAT_DIM]
    mu = fused[:B, PAD:PAD + LAT_DIM]
    log_sigma = fused[:B, 2 * PAD:2 * PAD + LAT_DIM]
    return z, mu, log_sigma


if __name__ == "__main__":
    key = jax.random.PRNGKey(0)
    k_x, k_w, k_b, k_n = jax.random.split(key, 4)

    B = 2
    # Synthetic params; shapes from nn.Linear(256, 400), stored as (in, out).
    weight = jax.random.normal(k_w, (IN_DIM, HID_DIM), jnp.float32) * 0.02
    bias = jax.random.normal(k_b, (1, HID_DIM), jnp.float32) * 0.01

    sentence_embed = jax.random.normal(k_x, (B, IN_DIM), jnp.float32)
    noise = jax.random.normal(k_n, (B, LAT_DIM), jnp.float32)  # randn_like(sigma)

    w_packed, b_packed = prepare_params(weight, bias)
    z, mu, log_sigma = mu_logsigma_getter(sentence_embed, w_packed, b_packed, noise)
    jax.block_until_ready((z, mu, log_sigma))

    # Reference in plain JAX using the same bf16-matmul / f32-accumulate recipe.
    y_ref = jnp.dot(sentence_embed.astype(jnp.bfloat16),
                    weight.astype(jnp.bfloat16),
                    preferred_element_type=jnp.float32) + bias
    h_ref = y_ref[:, :GLU_DIM] * jax.nn.sigmoid(y_ref[:, GLU_DIM:])
    mu_ref = h_ref[:, :LAT_DIM]
    ls_ref = h_ref[:, LAT_DIM:]
    z_ref = noise * jnp.exp(0.5 * ls_ref) + mu_ref

    assert jnp.allclose(mu, mu_ref, atol=1e-3, rtol=1e-3), "mu mismatch"
    assert jnp.allclose(log_sigma, ls_ref, atol=1e-3, rtol=1e-3), "log_sigma mismatch"
    assert jnp.allclose(z, z_ref, atol=1e-3, rtol=1e-3), "z mismatch"

    print("KERNEL_OK")
</pallas_src>

<mosaic_0001>
module attributes {stable_mosaic.version = 11 : i64} {
  func.func @_mu_logsigma_kernel(%arg0: i32, %arg1: memref<2x256xf32, #tpu.memory_space<vmem>>, %arg2: memref<256x512xbf16, #tpu.memory_space<vmem>>, %arg3: memref<1x512xf32, #tpu.memory_space<vmem>>, %arg4: memref<2x128xf32, #tpu.memory_space<vmem>>, %arg5: memref<2x384xf32, #tpu.memory_space<vmem>>) attributes {dimension_semantics = [#tpu.dimension_semantics<parallel>], iteration_bounds = array<i64: 1>, scalar_prefetch = 0 : i64, scratch_operands = 0 : i64, tpu.core_type = #tpu.core_type<tc>, window_params = [{transform_indices = @transform_0, window_bounds = array<i64: 2, 256>}, {pipeline_mode = #tpu.pipeline_mode<synchronous>, transform_indices = @transform_1, window_bounds = array<i64: 256, 512>}, {pipeline_mode = #tpu.pipeline_mode<synchronous>, transform_indices = @transform_2, window_bounds = array<i64: 1, 512>}, {transform_indices = @transform_3, window_bounds = array<i64: 2, 128>}, {transform_indices = @transform_4, window_bounds = array<i64: 2, 384>}]} {
    %c0 = arith.constant 0 : index
    %c0_0 = arith.constant 0 : index
    %0 = vector.load %arg1[%c0, %c0_0] : memref<2x256xf32, #tpu.memory_space<vmem>>, vector<2x256xf32>
    %1 = arith.truncf %0 : vector<2x256xf32> to vector<2x256xbf16>
    %c0_1 = arith.constant 0 : index
    %c0_2 = arith.constant 0 : index
    %2 = vector.load %arg2[%c0_1, %c0_2] : memref<256x512xbf16, #tpu.memory_space<vmem>>, vector<256x512xbf16>
    %cst = arith.constant dense<0.000000e+00> : vector<2x512xf32>
    %3 = tpu.matmul %1, %2, %cst {dimension_numbers = #tpu.dot_dimension_numbers<[1], [0], [0], [1], [0, 0, 1, 1], [], []>} : vector<2x256xbf16>, vector<256x512xbf16>, vector<2x512xf32> -> vector<2x512xf32>
    %c0_3 = arith.constant 0 : index
    %c0_4 = arith.constant 0 : index
    %4 = vector.load %arg3[%c0_3, %c0_4] : memref<1x512xf32, #tpu.memory_space<vmem>>, vector<1x512xf32>
    %5 = vector.broadcast %4 : vector<1x512xf32> to vector<2x512xf32>
    %6 = arith.addf %3, %5 : vector<2x512xf32>
    %7 = vector.extract_strided_slice %6 {offsets = [0, 0], sizes = [2, 256], strides = [1, 1]} : vector<2x512xf32> to vector<2x256xf32>
    %8 = vector.extract_strided_slice %6 {offsets = [0, 256], sizes = [2, 256], strides = [1, 1]} : vector<2x512xf32> to vector<2x256xf32>
    %9 = arith.negf %8 : vector<2x256xf32>
    %10 = math.exp %9 : vector<2x256xf32>
    %cst_5 = arith.constant 1.000000e+00 : f32
    %11 = vector.broadcast %cst_5 : f32 to vector<2x256xf32>
    %12 = arith.addf %11, %10 : vector<2x256xf32>
    %13 = arith.divf %11, %12 : vector<2x256xf32>
    %14 = arith.mulf %7, %13 : vector<2x256xf32>
    %15 = vector.extract_strided_slice %14 {offsets = [0, 0], sizes = [2, 128], strides = [1, 1]} : vector<2x256xf32> to vector<2x128xf32>
    %16 = vector.extract_strided_slice %14 {offsets = [0, 128], sizes = [2, 128], strides = [1, 1]} : vector<2x256xf32> to vector<2x128xf32>
    %cst_6 = arith.constant 5.000000e-01 : f32
    %17 = vector.broadcast %cst_6 : f32 to vector<2x128xf32>
    %18 = arith.mulf %17, %16 : vector<2x128xf32>
    %19 = math.exp %18 : vector<2x128xf32>
    %c0_7 = arith.constant 0 : index
    %c0_8 = arith.constant 0 : index
    %20 = vector.load %arg4[%c0_7, %c0_8] : memref<2x128xf32, #tpu.memory_space<vmem>>, vector<2x128xf32>
    %21 = arith.mulf %20, %19 : vector<2x128xf32>
    %22 = arith.addf %21, %15 : vector<2x128xf32>
    %23 = tpu.concatenate %22, %15, %16 in 1 : vector<2x128xf32>, vector<2x128xf32>, vector<2x128xf32> -> vector<2x384xf32>
    %c0_9 = arith.constant 0 : index
    %c0_10 = arith.constant 0 : index
    %24 = vector.load %arg5[%c0_9, %c0_10] : memref<2x384xf32, #tpu.memory_space<vmem>>, vector<2x384xf32>
    tpu.vector_store %arg5[%c0_9, %c0_10], %23 {strides = array<i32>} : memref<2x384xf32, #tpu.memory_space<vmem>>, vector<2x384xf32>,
    return
  }
  func.func @transform_0(%arg0: i32) -> (i32, i32) {
    %c0_i32 = arith.constant 0 : i32
    %c0_i32_0 = arith.constant 0 : i32
    return %arg0, %c0_i32 : i32, i32
  }
  func.func @transform_1(%arg0: i32) -> (i32, i32) {
    %c0_i32 = arith.constant 0 : i32
    %c0_i32_0 = arith.constant 0 : i32
    %c0_i32_1 = arith.constant 0 : i32
    return %c0_i32, %c0_i32_0 : i32, i32
  }
  func.func @transform_2(%arg0: i32) -> (i32, i32) {
    %c0_i32 = arith.constant 0 : i32
    %c0_i32_0 = arith.constant 0 : i32
    %c0_i32_1 = arith.constant 0 : i32
    return %c0_i32, %c0_i32_0 : i32, i32
  }
  func.func @transform_3(%arg0: i32) -> (i32, i32) {
    %c0_i32 = arith.constant 0 : i32
    %c0_i32_0 = arith.constant 0 : i32
    return %arg0, %c0_i32 : i32, i32
  }
  func.func @transform_4(%arg0: i32) -> (i32, i32) {
    %c0_i32 = arith.constant 0 : i32
    %c0_i32_0 = arith.constant 0 : i32
    return %arg0, %c0_i32 : i32, i32
  }
}

</mosaic_0001>

<bundles_post_ra>
// kernel: tpu_custom_call.1
= control target key start
LH: loop header
LB: loop body
LE: loop exit
PB: predicated region body
PF: predicated region fallthrough
CT: control target
= control target key end

     0   :  { %9 = vsyncpa [#allocation3], 0  ;;  %s934_s0 = inlined_call_operand.hbm [shape: f32[2,256], index: 0, kind: input, shape index: {}]   ;;  %s935_s1 = inlined_call_operand.hbm [shape: bf16[256,512], index: 1, kind: input, shape index: {}]   ;;  %s936_s2 = inlined_call_operand.vmem [shape: f32[1,512], index: 2, kind: input, shape index: {}]   ;;  %s937_s3 = inlined_call_operand.vmem [shape: f32[2,128], index: 3, kind: input, shape index: {}]   ;;  %s938_s4 = inlined_call_operand.hbm [shape: f32[2,384], index: 4, kind: output, shape index: {}]  }
   0x1   :  { %10 = vsyncpa [#allocation6], 0 }
   0x2   :  { %11 = vsyncpa [#allocation4], 0  ;;  %s854_s15 = smov [#allocation2]   ;;  %s855_s17 = smov [#allocation5]  }
   0x3   :  { %s18_s16 = sshll.u32 %s854_s15, 4  ;;  %s27_s18 = sshll.u32 %s855_s17, 4  ;;  %s19_s16 = int_to_ptr.vmem [resolvable:$true] %s18_s16  ;;  %s885_s18 = int_to_ptr.vmem [resolvable:$true] %s27_s18 }
   0x4   :  { %s782_s21 = scalar_lea.hbm %s934_s0, 64 }
   0x5   :  { %p783_p0 = scmp.ne.s32.totalorder %s934_s0, %s782_s21  ;;  %p786_p1 = scmp.lt.u32.totalorder %s782_s21, %s934_s0 }
   0x7   :  { %p788_p2 = pnand %p786_p1, %p783_p0 }
   0x9   :  { %791 = shalt.err (!%p788_p2)
}
   0xa   :  { %s792_s26 = scalar_lea.vmem %s19_s16, 64  ;;  %p797_p4 = scmp.lt.s32.totalorder %s19_s16, %s19_s16 }
   0xb   :  { %p793_p3 = scmp.ne.s32.totalorder %s19_s16, %s792_s26  ;;  %p798_p5 = scmp.lt.s32.totalorder %s792_s26, %s792_s26 }
   0xd   :  { %p799_p6 = por %p798_p5, %p797_p4 }
   0xf   :  { %p800_p7 = pnand %p799_p6, %p793_p3 }
  0x11   :  { %803 = shalt.err (!%p800_p7)
}
  0x12   :  { %21 = dma.hbm_to_vmem [thread:$0]  %s934_s0, 64, %s19_s16, [#allocation3]  }
  0x13   :  { %s804_s5 = scalar_lea.hbm %s935_s1, 8192 }
  0x14   :  { %p805_p8 = scmp.ne.s32.totalorder %s935_s1, %s804_s5  ;;  %p808_p9 = scmp.lt.u32.totalorder %s804_s5, %s935_s1 }
  0x16   :  { %p810_p10 = pnand %p808_p9, %p805_p8 }
  0x18   :  { %813 = shalt.err (!%p810_p10)
}
  0x19   :  { %s814_s10 = scalar_lea.vmem %s885_s18, 8192  ;;  %p819_p12 = scmp.lt.s32.totalorder %s885_s18, %s885_s18 }
  0x1a   :  { %p815_p11 = scmp.ne.s32.totalorder %s885_s18, %s814_s10  ;;  %p820_p13 = scmp.lt.s32.totalorder %s814_s10, %s814_s10 }
  0x1c   :  { %p821_p0 = por %p820_p13, %p819_p12 }
  0x1e   :  { %p822_p1 = pnand %p821_p0, %p815_p11 }
  0x20   :  { %825 = shalt.err (!%p822_p1)
}
  0x21   :  { %s856_s0 = smov 256   ;;  %s857_s11 = smov 16  }
  0x22   :  { %33 = dma.hbm_to_vmem [thread:$0]  %s935_s1, 8192, %s885_s18, [#allocation6], %s856_s0, %s856_s0, %s857_s11  }
  0x23   :  { %848 = dma.done.wait [#allocation3], 64  }
  0x24   :  { %849 = vsyncadd [#allocation3], 4294967232 }
  0x25   :  { %850 = dma.done.wait [#allocation6], 8192  }
  0x26   :  { %851 = vsyncadd [#allocation6], 4294959104  ;;  %v676_v0 = vld [vmem:[#allocation5 + $0xc] ss:$16 sps:$4 sm:$0xff]   ;;  %v678_v1 = vld [vmem:[#allocation5 + $0x8] ss:$16 sps:$4 sm:$0xff]  }
  0x27   :  { %505 = vmatprep.subr.bf16.mxu1 %v676_v0  ;;  %v679_v2 = vld [vmem:[#allocation5 + $0x2c] ss:$16 sps:$4 sm:$0xff]   ;;  %v681_v3 = vld [vmem:[#allocation5 + $0x28] ss:$16 sps:$4 sm:$0xff]   ;;  %v694_v7 = vld [vmem:[#allocation5 + $0x4] ss:$16 sps:$4 sm:$0xff]  }
  0x28   :  { %506 = vmatpush1.bf16.msra.mxu1 %v678_v1  ;;  %v682_v4 = vld [vmem:[#allocation5 + $0x4c] ss:$16 sps:$4 sm:$0xff]   ;;  %v684_v5 = vld [vmem:[#allocation5 + $0x48] ss:$16 sps:$4 sm:$0xff]   ;;  %v696_v8 = vld [vmem:[#allocation5] ss:$16 sps:$4 sm:$0xff]   ;;  %464 = vmatprep.subr.bf16.mxu0 %v694_v7 }
  0x29   :  { %507 = vmatprep.subr.bf16.mxu1 %v679_v2  ;;  %v685_v6 = vld [vmem:[#allocation5 + $0x6c] ss:$16 sps:$4 sm:$0xff]   ;;  %v687_v9 = vld [vmem:[#allocation5 + $0x68] ss:$16 sps:$4 sm:$0xff]   ;;  %465 = vmatpush1.bf16.msra.mxu0 %v696_v8  ;;  %v700_v10 = vld [vmem:[#allocation5 + $0x24] ss:$16 sps:$4 sm:$0xff]  }
  0x2a   :  { %v702_v11 = vld [vmem:[#allocation5 + $0x20] ss:$16 sps:$4 sm:$0xff]   ;;  %v688_v12 = vld [vmem:[#allocation5 + $0x8c] ss:$16 sps:$4 sm:$0xff]   ;;  %466 = vmatprep.subr.bf16.mxu0 %v700_v10  ;;  %v690_v13 = vld [vmem:[#allocation5 + $0x88] ss:$16 sps:$4 sm:$0xff]  }
  0x2b   :  { %v706_v14 = vld [vmem:[#allocation5 + $0x44] ss:$16 sps:$4 sm:$0xff]   ;;  %v691_v15 = vld [vmem:[#allocation5 + $0xac] ss:$16 sps:$4 sm:$0xff]   ;;  %v708_v16 = vld [vmem:[#allocation5 + $0x40] ss:$16 sps:$4 sm:$0xff]  }
  0x2c   :  { %508 = vmatpush1.bf16.msra.mxu1 %v681_v3  ;;  %v712_v17 = vld [vmem:[#allocation5 + $0x64] ss:$16 sps:$4 sm:$0xff]   ;;  %v693_v18 = vld [vmem:[#allocation5 + $0xa8] ss:$16 sps:$4 sm:$0xff]   ;;  %v697_v19 = vld [vmem:[#allocation5 + $0xcc] ss:$16 sps:$4 sm:$0xff]  }
  0x2d   :  { %509 = vmatprep.subr.bf16.mxu1 %v682_v4  ;;  %467 = vmatpush1.bf16.msra.mxu0 %v702_v11  ;;  %v714_v20 = vld [vmem:[#allocation5 + $0x60] ss:$16 sps:$4 sm:$0xff]   ;;  %v718_v21 = vld [vmem:[#allocation5 + $0x84] ss:$16 sps:$4 sm:$0xff]   ;;  %v699_v22 = vld [vmem:[#allocation5 + $0xc8] ss:$16 sps:$4 sm:$0xff]   ;;  %v124_v4 = vlaneseq }
  0x2e   :  { %468 = vmatprep.subr.bf16.mxu0 %v706_v14  ;;  %v703_v23 = vld [vmem:[#allocation5 + $0xec] ss:$16 sps:$4 sm:$0xff]   ;;  %v720_v24 = vld [vmem:[#allocation5 + $0x80] ss:$16 sps:$4 sm:$0xff]   ;;  %v724_v25 = vld [vmem:[#allocation5 + $0xa4] ss:$16 sps:$4 sm:$0xff]  }
  0x2f   :  { %v705_v26 = vld [vmem:[#allocation5 + $0xe8] ss:$16 sps:$4 sm:$0xff]   ;;  %v709_v27 = vld [vmem:[#allocation5 + $0x10c] ss:$16 sps:$4 sm:$0xff]   ;;  %v726_v28 = vld [vmem:[#allocation5 + $0xa0] ss:$16 sps:$4 sm:$0xff]  }
  0x30   :  { %510 = vmatpush1.bf16.msra.mxu1 %v684_v5  ;;  %v730_v29 = vld [vmem:[#allocation5 + $0xc4] ss:$16 sps:$4 sm:$0xff]   ;;  %v711_v30 = vld [vmem:[#allocation5 + $0x108] ss:$16 sps:$4 sm:$0xff]   ;;  %v715_v31 = vld [vmem:[#allocation5 + $0x12c] ss:$16 sps:$4 sm:$0xff]  }
  0x31   :  { %511 = vmatprep.subr.bf16.mxu1 %v685_v6  ;;  %469 = vmatpush1.bf16.msra.mxu0 %v708_v16  ;;  %v732_v32 = vld [vmem:[#allocation5 + $0xc0] ss:$16 sps:$4 sm:$0xff]   ;;  %v736_v33 = vld [vmem:[#allocation5 + $0xe4] ss:$16 sps:$4 sm:$0xff]   ;;  %v717_v34 = vld [vmem:[#allocation5 + $0x128] ss:$16 sps:$4 sm:$0xff]  }
  0x32   :  { %470 = vmatprep.subr.bf16.mxu0 %v712_v17  ;;  %v721_v35 = vld [vmem:[#allocation5 + $0x14c] ss:$16 sps:$4 sm:$0xff]   ;;  %v738_v36 = vld [vmem:[#allocation5 + $0xe0] ss:$16 sps:$4 sm:$0xff]   ;;  %v742_v37 = vld [vmem:[#allocation5 + $0x104] ss:$16 sps:$4 sm:$0xff]  }
  0x33   :  { %v603_v38 = vld.sshfl [vmem:[#allocation2] sm:$0x33 pattern:$0x76325410]  ;;  %v723_v40 = vld [vmem:[#allocation5 + $0x148] ss:$16 sps:$4 sm:$0xff]  }
  0x34   :  { %512 = vmatpush1.bf16.msra.mxu1 %v687_v9  ;;  %v53_v39 = vcombine.high %v603_v38, %v603_v38  ;;  %v727_v41 = vld [vmem:[#allocation5 + $0x16c] ss:$16 sps:$4 sm:$0xff]   ;;  %v744_v42 = vld [vmem:[#allocation5 + $0x100] ss:$16 sps:$4 sm:$0xff]   ;;  %v748_v44 = vld [vmem:[#allocation5 + $0x124] ss:$16 sps:$4 sm:$0xff]   ;;  %v56_v0 = vpack.c.bf16 %v603_v38, %v603_v38 }
  0x35   :  { %513 = vmatprep.subr.bf16.mxu1 %v688_v12  ;;  %471 = vmatpush1.bf16.msra.mxu0 %v714_v20  ;;  %v729_v45 = vld [vmem:[#allocation5 + $0x168] ss:$16 sps:$4 sm:$0xff]   ;;  %v750_v46 = vld [vmem:[#allocation5 + $0x120] ss:$16 sps:$4 sm:$0xff]   ;;  %v733_v47 = vld [vmem:[#allocation5 + $0x18c] ss:$16 sps:$4 sm:$0xff]  }
  0x36   :  { %472 = vmatprep.subr.bf16.mxu0 %v718_v21  ;;  %v57_v43 = vpack.c.bf16 %v53_v39, %v53_v39  ;;  %v754_v48 = vld [vmem:[#allocation5 + $0x144] ss:$16 sps:$4 sm:$0xff]   ;;  %v735_v49 = vld [vmem:[#allocation5 + $0x188] ss:$16 sps:$4 sm:$0xff]   ;;  %v756_v50 = vld [vmem:[#allocation5 + $0x140] ss:$16 sps:$4 sm:$0xff]  }
  0x37   :  { %v739_v51 = vld [vmem:[#allocation5 + $0x1ac] ss:$16 sps:$4 sm:$0xff]   ;;  %v757_v52 = vld [vmem:[#allocation5 + $0x164] ss:$16 sps:$4 sm:$0xff]   ;;  %v741_v53 = vld [vmem:[#allocation5 + $0x1a8] ss:$16 sps:$4 sm:$0xff]  }
  0x38   :  { %514 = vmatpush1.bf16.msra.mxu1 %v690_v13  ;;  %537 = vmatprep.mubr.bf16.mxu1 %v57_v43  ;;  %v759_v54 = vld [vmem:[#allocation5 + $0x160] ss:$16 sps:$4 sm:$0xff]   ;;  %v745_v55 = vld [vmem:[#allocation5 + $0x1cc] ss:$16 sps:$4 sm:$0xff]   ;;  %v760_v56 = vld [vmem:[#allocation5 + $0x184] ss:$16 sps:$4 sm:$0xff]  }
  0x39   :  { %515 = vmatprep.subr.bf16.mxu1 %v691_v15  ;;  %473 = vmatpush1.bf16.msra.mxu0 %v720_v24  ;;  %v747_v57 = vld [vmem:[#allocation5 + $0x1c8] ss:$16 sps:$4 sm:$0xff]   ;;  %v762_v58 = vld [vmem:[#allocation5 + $0x180] ss:$16 sps:$4 sm:$0xff]   ;;  %v751_v59 = vld [vmem:[#allocation5 + $0x1ec] ss:$16 sps:$4 sm:$0xff]  }
  0x3a   :  { %474 = vmatprep.subr.bf16.mxu0 %v724_v25  ;;  %496 = vmatprep.mubr.bf16.mxu0 %v57_v43  ;;  %v763_v60 = vld [vmem:[#allocation5 + $0x1a4] ss:$16 sps:$4 sm:$0xff]   ;;  %v753_v61 = vld [vmem:[#allocation5 + $0x1e8] ss:$16 sps:$4 sm:$0xff]   ;;  %v765_v62 = vld [vmem:[#allocation5 + $0x1a0] ss:$16 sps:$4 sm:$0xff]  }
  0x3b   :  { %v766_v63 = vld [vmem:[#allocation5 + $0x1c4] ss:$16 sps:$4 sm:$0xff]   ;;  %v768_v1 = vld [vmem:[#allocation5 + $0x1c0] ss:$16 sps:$4 sm:$0xff]   ;;  %v125_v5 = vshrl.u32 %v124_v4, 7  ;;  %s859_s16 = smov [#allocation7]  }
  0x3c   :  { %516 = vmatpush1.bf16.msra.mxu1 %v693_v18  ;;  %v769_v2 = vld [vmem:[#allocation5 + $0x1e4] ss:$16 sps:$4 sm:$0xff]   ;;  %v771_v3 = vld [vmem:[#allocation5 + $0x1e0] ss:$16 sps:$4 sm:$0xff]   ;;  %v122_v7 = vld [vmem:[%s936_s2] sm:$0xf] }
  0x3d   :  { %517 = vmatprep.subr.bf16.mxu1 %v697_v19  ;;  %475 = vmatpush1.bf16.msra.mxu0 %v726_v28  ;;  %v134_v6 = vsub.s32 2, %v125_v5  ;;  %v138_v8 = vsub.s32 3, %v125_v5  ;;  %v130_v28 = vsub.s32 1, %v125_v5  ;;  %v858_v39 = vmov 1983009808   ;;  %s593_s17 = sshll.u32 %s859_s16, 4  ;;  %s594_s17 = int_to_ptr.vmem [resolvable:$true] %s593_s17 }
  0x3e   :  { %476 = vmatprep.subr.bf16.mxu0 %v730_v29  ;;  %s826_s18 = scalar_lea.vmem %s594_s17, 96  ;;  %p831_p3 = scmp.lt.s32.totalorder %s594_s17, %s594_s17 }
  0x3f   :  { %v135_v9 = vrot.slane %v122_v7, %v134_v6  ;;  %v139_v10 = vrot.slane %v122_v7, %v138_v8  ;;  %p827_p2 = scmp.ne.s32.totalorder %s594_s17, %s826_s18  ;;  %p832_p4 = scmp.lt.s32.totalorder %s826_s18, %s826_s18 }
  0x40   :  { %518 = vmatpush1.bf16.msra.mxu1 %v699_v22 }
  0x41   :  { %519 = vmatprep.subr.bf16.mxu1 %v703_v23  ;;  %477 = vmatpush1.bf16.msra.mxu0 %v732_v32  ;;  %p833_p5 = por %p832_p4, %p831_p3 }
  0x42   :  { %478 = vmatprep.subr.bf16.mxu0 %v736_v33 }
  0x43   :  { %p834_p6 = pnand %p833_p5, %p827_p2 }
  0x44   :  { %520 = vmatpush1.bf16.msra.mxu1 %v705_v26 }
  0x45   :  { %521 = vmatprep.subr.bf16.mxu1 %v709_v27  ;;  %479 = vmatpush1.bf16.msra.mxu0 %v738_v36  ;;  %v126_v27 = vsub.s32 0, %v125_v5 }
  0x46   :  { %480 = vmatprep.subr.bf16.mxu0 %v742_v37 }
  0x47   :  { %v127_v29 = vrot.slane %v122_v7, %v126_v27 }
  0x48   :  { %522 = vmatpush1.bf16.msra.mxu1 %v711_v30  ;;  %v131_v30 = vrot.slane %v122_v7, %v130_v28 }
  0x49   :  { %523 = vmatprep.subr.bf16.mxu1 %v715_v31  ;;  %481 = vmatpush1.bf16.msra.mxu0 %v744_v42 }
  0x4a   :  { %482 = vmatprep.subr.bf16.mxu0 %v748_v44 }
  0x4c   :  { %524 = vmatpush1.bf16.msra.mxu1 %v717_v34 }
  0x4d   :  { %525 = vmatprep.subr.bf16.mxu1 %v721_v35  ;;  %483 = vmatpush1.bf16.msra.mxu0 %v750_v46 }
  0x4e   :  { %484 = vmatprep.subr.bf16.mxu0 %v754_v48 }
  0x50   :  { %526 = vmatpush1.bf16.msra.mxu1 %v723_v40  ;;  %v571_v40 = vunpack.c.l.s4 %v858_v39 }
  0x51   :  { %527 = vmatprep.subr.bf16.mxu1 %v727_v41  ;;  %485 = vmatpush1.bf16.msra.mxu0 %v756_v50  ;;  %v563_v41 = vld [vmem:[%s937_s3] sm:$0x3] }
  0x52   :  { %486 = vmatprep.subr.bf16.mxu0 %v757_v52  ;;  %v572_v42 = vunpack.c.0.s8 %v571_v40 }
  0x54   :  { %528 = vmatpush1.bf16.msra.mxu1 %v729_v45  ;;  %v575_v45 = vsub.s32 %v572_v42, %v125_v5 }
  0x55   :  { %529 = vmatprep.subr.bf16.mxu1 %v733_v47  ;;  %487 = vmatpush1.bf16.msra.mxu0 %v759_v54 }
  0x56   :  { %488 = vmatprep.subr.bf16.mxu0 %v760_v56 }
  0x58   :  { %530 = vmatpush1.bf16.msra.mxu1 %v735_v49 }
  0x59   :  { %531 = vmatprep.subr.bf16.mxu1 %v739_v51  ;;  %489 = vmatpush1.bf16.msra.mxu0 %v762_v58 }
  0x5a   :  { %490 = vmatprep.subr.bf16.mxu0 %v763_v60 }
  0x5c   :  { %532 = vmatpush1.bf16.msra.mxu1 %v741_v53 }
  0x5d   :  { %533 = vmatprep.subr.bf16.mxu1 %v745_v55  ;;  %491 = vmatpush1.bf16.msra.mxu0 %v765_v62 }
  0x5e   :  { %492 = vmatprep.subr.bf16.mxu0 %v766_v63 }
  0x60   :  { %534 = vmatpush1.bf16.msra.mxu1 %v747_v57 }
  0x61   :  { %535 = vmatprep.subr.bf16.mxu1 %v751_v59  ;;  %493 = vmatpush1.bf16.msra.mxu0 %v768_v1 }
  0x62   :  { %494 = vmatprep.subr.bf16.mxu0 %v769_v2 }
  0x64   :  { %536 = vmatpush1.bf16.msra.mxu1 %v753_v61 }
  0x65   :  { %495 = vmatpush1.bf16.msra.mxu0 %v771_v3 }
  0x67   :  { %538 = vmatmul.mubr.bf16.vlgmr.msra.gmra.mrb[0].mxu1 %v56_v0 }
  0x68   :  { %497 = vmatmul.mubr.bf16.vlgmr.msra.gmra.mrb[0].mxu0 %v56_v0 }
 0x13a   :  { %v539_v11 = vpop.f32.mrb[0].mxu1 }
 0x13b   :  { %v540_v12 = vadd.f32 %v539_v11, %v135_v9  ;;  %v541_v13 = vpop.f32.mrb[1].mxu1  ;;  %v498_v19 = vpop.f32.mrb[0].mxu0 }
 0x13c   :  { %v542_v14 = vadd.f32 %v541_v13, %v139_v10  ;;  %v543_v15 = vpop.f32.mrb[2].mxu1  ;;  %v500_v20 = vpop.f32.mrb[1].mxu0  ;;  %v499_v31 = vadd.f32 %v498_v19, %v127_v29 }
 0x13d   :  { %v668_v16 = vmul.f32 -1.442695, %v540_v12  ;;  %v544_v17 = vpop.f32.mrb[3].mxu1  ;;  %v502_v21 = vpop.f32.mrb[2].mxu0  ;;  %v501_v32 = vadd.f32 %v500_v20, %v131_v30 }
 0x13e   :  { %v669_v18 = vmul.f32 -1.442695, %v542_v14  ;;  %v503_v22 = vpop.f32.mrb[3].mxu0 }
 0x13f   :  { %772 = vpow2.f32 %v668_v16 }
 0x140   :  { %774 = vpow2.f32 %v669_v18 }
 0x149   :  { %v773_v23 = vpop.eup %772 }
 0x14a   :  { %v775_v24 = vpop.eup %774  ;;  %v552_v25 = vadd.f32 1.0, %v773_v23 }
 0x14b   :  { %v553_v26 = vadd.f32 1.0, %v775_v24 }
 0x14c   :  { %776 = vrcp.f32 %v552_v25 }
 0x14d   :  { %778 = vrcp.f32 %v553_v26 }
 0x156   :  { %v777_v33 = vpop.eup %776 }
 0x157   :  { %v779_v34 = vpop.eup %778  ;;  %v558_v35 = vmul.f32 %v777_v33, %v499_v31 }
 0x158   :  { %v559_v36 = vmul.f32 %v779_v34, %v501_v32 }
 0x15a   :  { %v560_v37 = vmul.f32 0.5, %v559_v36  ;;  %v583_v48 = vrot.slane %v559_v36, %v575_v45 }
 0x15c   :  { %v561_v38 = vmul.f32 1.442695, %v560_v37 }
 0x15e   :  { %780 = vpow2.f32 %v561_v38 }
 0x168   :  { %v781_v43 = vpop.eup %780 }
 0x169   :  { %v564_v44 = vmul.f32 %v781_v43, %v563_v41 }
 0x16b   :  { %v565_v46 = vadd.f32 %v564_v44, %v558_v35 }
 0x16d   :  { %v569_v47 = vcombine.low %v565_v46, %v558_v35 }
 0x16f   :  { %v576_v49 = vrot.slane %v569_v47, %v575_v45 }
 0x171   :  { %v584_v50 = vcombine.low %v576_v49, %v583_v48 }
 0x173   :  { %586 = vst [vmem:[#allocation7] sm:$0x3f] %v584_v50 }
 0x174   :  { %837 = shalt.err (!%p834_p6)
}
 0x175   :  { %s838_s20 = scalar_lea.hbm %s938_s4, 96 }
 0x176   :  { %p839_p7 = scmp.ne.s32.totalorder %s938_s4, %s838_s20  ;;  %p842_p8 = scmp.lt.u32.totalorder %s838_s20, %s938_s4 }
 0x178   :  { %p844_p9 = pnand %p842_p8, %p839_p7 }
 0x17a   :  { %847 = shalt.err (!%p844_p9)
}
 0x17b   :  { %596 = dma.vmem_to_hbm [thread:$0]  %s594_s17, 96, %s938_s4, [#allocation4]  }
 0x17c   :  { %852 = dma.done.wait [#allocation4], 96  }
 0x17d   :  { %853 = vsyncadd [#allocation4], 4294967200 }
 0x17e   :  { %600 = vsyncpa [#allocation3], 1 }
 0x17f   :  { %601 = vsyncpa [#allocation6], 1 }
 0x180   :  { %602 = vsyncpa [#allocation4], 1 }

</bundles_post_ra>
